<compile_context>
chip_gen: v7x
topology: tpu7x:2x2x1
jax: 0.10.0
libtpu: 0.0.40
codegen_flags: <defaults>
</compile_context>

<pallas_src>
import math
import functools

import numpy as np
import jax
import jax.numpy as jnp
from jax.experimental import pallas as pl
from jax.experimental.pallas import tpu as pltpu


# ---------------------------------------------------------------------------
# pe table construction (init-time NumPy) -- bug-for-bug with the PyTorch loop
#   pe[pos, i]   = sin(pos / 10000 ** (2 * i       / embed_dim))   (even i)
#   pe[pos, i+1] = cos(pos / 10000 ** (2 * (i + 1) / embed_dim))
# ---------------------------------------------------------------------------
def make_positional_table(max_seq_len: int, embed_dim: int) -> jnp.ndarray:
    assert embed_dim % 2 == 0, "embed_dim must be even (PyTorch module assumes this)"
    pos = np.arange(max_seq_len, dtype=np.float64)[:, None]        # (L, 1)
    i = np.arange(0, embed_dim, 2, dtype=np.float64)[None, :]      # (1, D/2)
    sin_den = np.power(10000.0, 2.0 * i / embed_dim)
    cos_den = np.power(10000.0, 2.0 * (i + 1.0) / embed_dim)
    pe = np.zeros((max_seq_len, embed_dim), dtype=np.float32)
    pe[:, 0::2] = np.sin(pos / sin_den).astype(np.float32)
    pe[:, 1::2] = np.cos(pos / cos_den).astype(np.float32)
    return jnp.asarray(pe)


# ---------------------------------------------------------------------------
# kernel body (shared by both layouts)
# ---------------------------------------------------------------------------
def _posemb_kernel(x_ref, pe_ref, o_ref, *, scale: float):
    # x_ref/o_ref: (TR, TC) tile.  pe_ref: (1, TC) or (TR, TC) tile (broadcasts).
    # `scale` is a weakly-typed python float so x keeps its dtype (bf16 stays bf16).
    o_ref[...] = (x_ref[...] * scale + pe_ref[...]).astype(o_ref.dtype)


# ---------------------------------------------------------------------------
# tiling helpers
# ---------------------------------------------------------------------------
_LANE_CAP = 8192                 # max lanes per tile
_TARGET_TILE_BYTES = 4 << 20     # ~4 MiB per x tile (amortizes ~0.35us/step overhead)
_MAX_TILE_BYTES = 6 << 20        # hard per-tile ceiling before shrinking / padding


def _sublane_unit(dtype) -> int:
    # f32 -> 8, bf16/f16 -> 16, int8/fp8 -> 32 (packed sublanes per vreg tile).
    return max(8, 8 * (4 // jnp.dtype(dtype).itemsize))


def _divisor_tile(full: int, unit: int, cap: int) -> int:
    """Largest multiple of `unit` that divides `full` and is <= cap.
    Callers guarantee full % unit == 0 (worst case returns `unit`)."""
    if full <= cap:
        return full
    t = (cap // unit) * unit
    while t >= unit:
        if full % t == 0:
            return t
        t -= unit
    return unit


# ---------------------------------------------------------------------------
# forward
# ---------------------------------------------------------------------------
def positional_embedding_forward(x: jnp.ndarray, pe_table: jnp.ndarray) -> jnp.ndarray:
    """x: (B, S, D).  pe_table: (L >= S, D).  Returns (B, S, D) in x.dtype."""
    B, S, D = x.shape
    L, Dp = pe_table.shape
    assert Dp == D, "embed_dim mismatch"
    assert L >= S, "seq_len exceeds max_seq_len"

    dtype = x.dtype
    itemsize = jnp.dtype(dtype).itemsize
    sub = _sublane_unit(dtype)
    scale = math.sqrt(float(D))
    N = S * D

    # Slice to seq_len and cast once (outside the kernel) so there is no implicit
    # f32 upcast of every tile when x is bf16.  (The PositionalEmbedding class
    # below caches this so it is hoisted out of the per-call hot path.)
    pe = pe_table
    if L != S:
        pe = pe[:S]
    if pe.dtype != dtype:
        pe = pe.astype(dtype)

    kernel = functools.partial(_posemb_kernel, scale=scale)
    cost = pl.CostEstimate(flops=2 * B * N, transcendentals=0,
                           bytes_accessed=(2 * B * N + N) * itemsize)

    def _call(x2, pe2, grid, x_map, pe_map, block_x, block_pe, est_bytes, sems):
        vmem_limit = int(min(64 << 20, max(16 << 20, est_bytes + (4 << 20))))
        return pl.pallas_call(
            kernel,
            out_shape=jax.ShapeDtypeStruct(x2.shape, dtype),
            grid_spec=pltpu.PrefetchScalarGridSpec(
                num_scalar_prefetch=0,
                grid=grid,
                in_specs=[pl.BlockSpec(block_x, x_map),
                          pl.BlockSpec(block_pe, pe_map)],
                out_specs=pl.BlockSpec(block_x, x_map),
            ),
            compiler_params=pltpu.CompilerParams(
                dimension_semantics=sems,
                vmem_limit_bytes=vmem_limit,
            ),
            cost_estimate=cost,
        )(x2, pe2)

    # ---- layout selection ---------------------------------------------------
    use_a = (not (N % 128 == 0 and B % sub == 0)) and (D % 128 == 0) and (S % sub == 0)

    if use_a:
        # "A" layout: rows = B*S, cols = D.  Full sublanes even for tiny batch.
        x2 = x.reshape(B * S, D)
        TD = _divisor_tile(D, 128, _LANE_CAP)
        row_cap = max(sub, (_TARGET_TILE_BYTES // (TD * itemsize)) // sub * sub)
        TR = _divisor_tile(S, sub, row_cap)
        s_tiles, d_tiles = S // TR, D // TD
        grid = (d_tiles, s_tiles, B)                   # batch innermost -> pe resident
        x_map = lambda d, s, b: (b * s_tiles + s, d)
        pe_map = lambda d, s, b: (s, d)
        est = 6 * TR * TD * itemsize                   # 2 bufs each of x / out / pe
        out2 = _call(x2, pe, grid, x_map, pe_map, (TR, TD), (TR, TD), est,
                     ("parallel", "parallel", "parallel"))
        return out2.reshape(B, S, D)

    # "B" layout: rows = B, cols = S*D (lane-dense, pe is one broadcast row).
    pad = (-N) % 128
    if pad and B * N * itemsize <= _MAX_TILE_BYTES:
        pad = 0                                        # whole-array block is legal & small
    x2 = x.reshape(B, N)
    pe2 = pe.reshape(1, N)
    if pad:
        # TODO(synk): rare awkward-shape fallback (S*D not a 128 multiple and too
        # large for one block): lane-pad in the wrapper (one extra HBM copy of x).
        x2 = jnp.pad(x2, ((0, 0), (0, pad)))
        pe2 = jnp.pad(pe2, ((0, 0), (0, pad)))
    Np = N + pad

    TC = _divisor_tile(Np, 128, _LANE_CAP) if Np % 128 == 0 else Np
    if B % sub == 0:
        row_cap = max(sub, (_TARGET_TILE_BYTES // (TC * itemsize)) // sub * sub)
        TR = _divisor_tile(B, sub, row_cap)
    else:
        TR = B                                         # full-dim row block (legal)
        while TR * TC * itemsize > _MAX_TILE_BYTES and Np % 128 == 0:
            smaller = _divisor_tile(Np, 128, TC // 2)
            if smaller == TC:
                break
            TC = smaller

    n_col, n_row = Np // TC, B // TR
    grid = (n_col, n_row)                              # row axis innermost -> pe resident
    x_map = lambda c, r: (r, c)
    pe_map = lambda c, r: (0, c)
    est = 4 * TR * TC * itemsize + 2 * sub * TC * itemsize
    out2 = _call(x2, pe2, grid, x_map, pe_map, (TR, TC), (1, TC), est,
                 ("parallel", "parallel"))
    if pad:
        out2 = out2[:, :N]
    return out2.reshape(B, S, D)


# ---------------------------------------------------------------------------
# module-like wrapper (caches the sliced / dtype-cast pe table per (S, dtype))
# ---------------------------------------------------------------------------
class PositionalEmbedding:
    """Pallas-TPU equivalent of the PyTorch PositionalEmbedding (forward only)."""

    def __init__(self, max_seq_len: int, embed_model_dim: int):
        self.embed_dim = embed_model_dim
        self.max_seq_len = max_seq_len
        self.pe = make_positional_table(max_seq_len, embed_model_dim)   # (L, D) f32
        self._pe_cache = {}
        self._fwd = jax.jit(positional_embedding_forward)

    def _pe_for(self, seq_len: int, dtype):
        key = (int(seq_len), jnp.dtype(dtype).name)
        if key not in self._pe_cache:
            self._pe_cache[key] = self.pe[:seq_len].astype(dtype)       # hoisted once
        return self._pe_cache[key]

    def __call__(self, x: jnp.ndarray) -> jnp.ndarray:
        return self._fwd(x, self._pe_for(x.shape[1], x.dtype))


# ---------------------------------------------------------------------------
# pure-JAX reference
# ---------------------------------------------------------------------------
def positional_embedding_reference(x: jnp.ndarray, pe_table: jnp.ndarray) -> jnp.ndarray:
    B, S, D = x.shape
    out = x.astype(jnp.float32) * math.sqrt(float(D)) + pe_table[:S].astype(jnp.float32)[None]
    return out.astype(x.dtype)


if __name__ == "__main__":
    # Shapes consistent with the module's forward: (batch, seq, embed_dim)
    max_seq_len, embed_dim = 16, 32
    batch, seq = 2, 8

    key = jax.random.PRNGKey(0)
    x = jax.random.normal(key, (batch, seq, embed_dim), dtype=jnp.float32)

    module = PositionalEmbedding(max_seq_len, embed_dim)
    out = jax.block_until_ready(module(x))
    ref = positional_embedding_reference(x, module.pe)
    np.testing.assert_allclose(np.asarray(out), np.asarray(ref), rtol=1e-6, atol=1e-6)

    # Extra coverage: small-batch (B*S, D) layout, f32 and bf16 (dtype-explicit path).
    mod2 = PositionalEmbedding(64, 128)
    x2 = jax.random.normal(jax.random.PRNGKey(0), (2, 16, 128), dtype=jnp.float32)
    out2 = jax.block_until_ready(mod2(x2))
    ref2 = positional_embedding_reference(x2, mod2.pe)
    np.testing.assert_allclose(np.asarray(out2), np.asarray(ref2), rtol=1e-6, atol=1e-6)

    x3 = x2.astype(jnp.bfloat16)
    out3 = jax.block_until_ready(mod2(x3))
    ref3 = positional_embedding_reference(x3, mod2.pe)
    np.testing.assert_allclose(np.asarray(out3.astype(jnp.float32)),
                               np.asarray(ref3.astype(jnp.float32)),
                               rtol=2e-2, atol=2e-1)

    print("KERNEL_OK")
</pallas_src>

<mosaic_0001>
module attributes {stable_mosaic.version = 11 : i64} {
  func.func @_posemb_kernel(%arg0: i32, %arg1: i32, %arg2: memref<2x256xf32, #tpu.memory_space<vmem>>, %arg3: memref<1x256xf32, #tpu.memory_space<vmem>>, %arg4: memref<2x256xf32, #tpu.memory_space<vmem>>) attributes {dimension_semantics = [#tpu.dimension_semantics<parallel>, #tpu.dimension_semantics<parallel>], iteration_bounds = array<i64: 1, 1>, scalar_prefetch = 0 : i64, scratch_operands = 0 : i64, tpu.core_type = #tpu.core_type<tc>, window_params = [{transform_indices = @transform_0, window_bounds = array<i64: 2, 256>}, {transform_indices = @transform_1, window_bounds = array<i64: 1, 256>}, {transform_indices = @transform_2, window_bounds = array<i64: 2, 256>}]} {
    %c0 = arith.constant 0 : index
    %c0_0 = arith.constant 0 : index
    %0 = vector.load %arg2[%c0, %c0_0] : memref<2x256xf32, #tpu.memory_space<vmem>>, vector<2x256xf32>
    %cst = arith.constant 5.65685415 : f32
    %1 = vector.broadcast %cst : f32 to vector<2x256xf32>
    %2 = arith.mulf %0, %1 : vector<2x256xf32>
    %c0_1 = arith.constant 0 : index
    %c0_2 = arith.constant 0 : index
    %3 = vector.load %arg3[%c0_1, %c0_2] : memref<1x256xf32, #tpu.memory_space<vmem>>, vector<1x256xf32>
    %4 = vector.broadcast %3 : vector<1x256xf32> to vector<2x256xf32>
    %5 = arith.addf %2, %4 : vector<2x256xf32>
    %c0_3 = arith.constant 0 : index
    %c0_4 = arith.constant 0 : index
    %6 = vector.load %arg4[%c0_3, %c0_4] : memref<2x256xf32, #tpu.memory_space<vmem>>, vector<2x256xf32>
    tpu.vector_store %arg4[%c0_3, %c0_4], %5 {strides = array<i32>} : memref<2x256xf32, #tpu.memory_space<vmem>>, vector<2x256xf32>,
    return
  }
  func.func @transform_0(%arg0: i32, %arg1: i32) -> (i32, i32) {
    %c0_i32 = arith.constant 0 : i32
    return %arg1, %arg0 : i32, i32
  }
  func.func @transform_1(%arg0: i32, %arg1: i32) -> (i32, i32) {
    %c0_i32 = arith.constant 0 : i32
    %c0_i32_0 = arith.constant 0 : i32
    return %c0_i32, %arg0 : i32, i32
  }
  func.func @transform_2(%arg0: i32, %arg1: i32) -> (i32, i32) {
    %c0_i32 = arith.constant 0 : i32
    return %arg1, %arg0 : i32, i32
  }
}

</mosaic_0001>

<bundles_post_ra>
// kernel: positional_embedding_forward.1
= control target key start
LH: loop header
LB: loop body
LE: loop exit
PB: predicated region body
PF: predicated region fallthrough
CT: control target
= control target key end

     0   :  { %v15_v0 = vlaneseq  ;;  %v39_v1 = vmov 1983009808   ;;  %s64_s1 = inlined_call_operand.vmem [shape: f32[1,256], index: 1, kind: input, shape index: {}]   ;;  %s65_s0 = inlined_call_operand.vmem [shape: f32[2,256], index: 0, kind: input, shape index: {}]   ;;  %s66_s2 = inlined_call_operand.vmem [shape: f32[2,256], index: 2, kind: output, shape index: {}]  }
   0x1   :  { %v25_v2 = vunpack.c.l.s4 %v39_v1  ;;  %v13_v4 = vld [vmem:[%s64_s1] sm:$0x3] }
   0x2   :  { %v16_v3 = vshrl.u32 %v15_v0, 7  ;;  %v11_v8 = vld [vmem:[%s65_s0] sm:$0xf] }
   0x3   :  { %v26_v5 = vunpack.c.0.s8 %v25_v2  ;;  %v12_v12 = vmul.f32 5.656854, %v11_v8 }
   0x4   :  { %v17_v6 = vsub.s32 0, %v16_v3  ;;  %v21_v7 = vsub.s32 1, %v16_v3 }
   0x5   :  { %v29_v11 = vsub.s32 %v26_v5, %v16_v3 }
   0x6   :  { %v18_v9 = vrot.slane %v13_v4, %v17_v6  ;;  %v22_v10 = vrot.slane %v13_v4, %v21_v7 }
   0x8   :  { %v23_v13 = vcombine.low %v18_v9, %v22_v10 }
   0xa   :  { %v30_v14 = vrot.slane %v23_v13, %v29_v11 }
   0xc   :  { %v32_v15 = vadd.f32 %v30_v14, %v12_v12 }
   0xe   :  { %33 = vst [vmem:[%s66_s2] sm:$0xf] %v32_v15 }

</bundles_post_ra>
